<compile_context>
chip_gen: v6e
topology: v6e:2x2x1
jax: 0.10.0
libtpu: 0.0.40
codegen_flags: <defaults>
</compile_context>

<pallas_src>
import functools

import jax
import jax.numpy as jnp
import numpy as np
from jax import lax
from jax.experimental import pallas as pl
from jax.experimental.pallas import tpu as pltpu


def _cdiv(a, b):
    return -(-a // b)


def _sublane_granule(dtype):
    # f32/i32 -> 8, bf16/f16 -> 16, i8/bool -> 32 (sublane packing).
    return {4: 8, 2: 16, 1: 32}.get(jnp.dtype(dtype).itemsize, 8)


def _dice_partials_kernel(x_ref, t_ref, inter_ref, psum_ref, tsum_ref, *,
                          n_rows, chunk, n_chunks, j_per_slot, n_p, n_t,
                          targets_are_labels, need_mask):
    """Accumulate per-channel lane partial sums for one (batch, slot, spatial) block.

    x_ref    : (1, C, ts, 128) logits block (any float dtype)
    t_ref    : (1, C, ts, 128) one-hot block, or (1, ts, 128) integer labels
    inter_ref: (1, 1, C,   128) f32 sum(p_c * t_c) lane partials (resident over j)
    psum_ref : (1, 1, n_p, 128) f32 sum(p_c) lane partials, c < n_p
    tsum_ref : (1, 1, n_t, 128) f32 sum(t_c) lane partials, c < n_t
    """
    C = x_ref.shape[1]
    ts = chunk * n_chunks
    j = pl.program_id(2)

    @pl.when(j == 0)
    def _init():
        inter_ref[...] = jnp.zeros_like(inter_ref)
        psum_ref[...] = jnp.zeros_like(psum_ref)
        tsum_ref[...] = jnp.zeros_like(tsum_ref)

    # Logical (unclamped) spatial block index -> valid rows remaining.
    block_idx = pl.program_id(1) * j_per_slot + j
    valid_rows = n_rows - block_idx * ts

    def chunk_body(i, carry):
        inter_acc, psum_acc, tsum_acc = carry
        row = pl.multiple_of(i * chunk, chunk)

        # ---- streamed softmax over channels for this (chunk, 128) slab ------
        x = x_ref[0, :, pl.ds(row, chunk), :].astype(jnp.float32)  # (C,chunk,128)
        m = jnp.max(x, axis=0, keepdims=True)
        e = jnp.exp(x - m)
        denom = jnp.sum(e, axis=0, keepdims=True)
        r = pl.reciprocal(denom, approx=True)        # EUP slot
        inv = r * (2.0 - denom * r)                  # one Newton step -> ~f32 exact
        p = e * inv                                  # (C, chunk, 128)

        if targets_are_labels:
            lab = t_ref[0, pl.ds(row, chunk), :].astype(jnp.float32)  # (chunk,128)
            t = jnp.concatenate(
                [(lab == float(c)).astype(jnp.float32)[None] for c in range(C)],
                axis=0)                              # (C, chunk, 128)
        else:
            t = t_ref[0, :, pl.ds(row, chunk), :].astype(jnp.float32)

        if need_mask:
            rid = lax.broadcasted_iota(jnp.int32, (chunk, 128), 0)
            ok = (rid < (valid_rows - row))[None]    # (1, chunk, 128)
            p = jnp.where(ok, p, 0.0)
            t = jnp.where(ok, t, 0.0)

        inter_acc = inter_acc + jnp.sum(p * t, axis=1)      # (C,   128)
        psum_acc = psum_acc + jnp.sum(p[:n_p], axis=1)      # (n_p, 128)
        tsum_acc = tsum_acc + jnp.sum(t[:n_t], axis=1)      # (n_t, 128)
        return inter_acc, psum_acc, tsum_acc

    init = (jnp.zeros((C, 128), jnp.float32),
            jnp.zeros((n_p, 128), jnp.float32),
            jnp.zeros((n_t, 128), jnp.float32))
    inter_acc, psum_acc, tsum_acc = lax.fori_loop(
        0, n_chunks, chunk_body, init, unroll=(n_chunks <= 8))

    # Three full-block RMWs per grid step (coalesced output traffic).
    inter_ref[0, 0] += inter_acc
    psum_ref[0, 0] += psum_acc
    tsum_ref[0, 0] += tsum_acc


def _dice_partial_sums(inputs, targets, *, targets_are_labels, compute_last_tsum,
                       max_ts, chunk_rows, spatial_slots, vmem_budget_bytes):
    N, C, H, W = inputs.shape
    M = H * W
    if M % 128 != 0:
        # TODO(synk): support H*W not divisible by 128 (needs a lane-validity
        # mask on a padded lane tail so softmax of pad pixels cannot leak in).
        raise ValueError(f"H*W (={M}) must be a multiple of 128.")
    n_rows = M // 128

    # ---- dtype-aware sublane granule and compute-chunk size -----------------
    g = max(8, _sublane_granule(inputs.dtype), _sublane_granule(targets.dtype))
    chunk = max(g, (chunk_rows // g) * g)

    # ---- VMEM-budgeted tile size (double-buffered x + t blocks) --------------
    x_row_bytes = C * 128 * jnp.dtype(inputs.dtype).itemsize
    t_row_bytes = (1 if targets_are_labels else C) * 128 * jnp.dtype(targets.dtype).itemsize
    bytes_per_row = x_row_bytes + t_row_bytes
    max_chunks_vmem = max(1, vmem_budget_bytes // (2 * chunk * bytes_per_row))
    max_chunks_cap = max(1, max_ts // chunk)
    chunks_needed = _cdiv(n_rows, chunk)
    n_chunks = int(min(max_chunks_vmem, max_chunks_cap, chunks_needed))
    ts = chunk * n_chunks
    n_blocks = _cdiv(n_rows, ts)

    # ---- optional spatial-slot parallel axis (keeps both v7x TCs busy at N=1) -
    if spatial_slots is None:
        spatial_slots = 2 if (N == 1 and n_blocks >= 2) else 1
    n_slots = max(1, min(int(spatial_slots), n_blocks))
    j_per_slot = _cdiv(n_blocks, n_slots)
    need_mask = (n_slots * j_per_slot * ts != n_rows)

    if n_slots * j_per_slot == n_blocks:
        def _blk(s, j):
            return s * j_per_slot + j
    else:
        def _blk(s, j):  # padded grid points re-read the last block (masked to 0)
            return jnp.minimum(s * j_per_slot + j, n_blocks - 1)

    x = inputs.reshape(N, C, n_rows, 128)          # free, contiguous reshape
    x_spec = pl.BlockSpec((1, C, ts, 128), lambda n, s, j: (n, 0, _blk(s, j), 0))
    if targets_are_labels:
        t = targets.reshape(N, n_rows, 128)        # stored dtype, no host cast
        t_spec = pl.BlockSpec((1, ts, 128), lambda n, s, j: (n, _blk(s, j), 0))
    else:
        t = targets.reshape(N, C, n_rows, 128)
        t_spec = pl.BlockSpec((1, C, ts, 128), lambda n, s, j: (n, 0, _blk(s, j), 0))

    n_p = C - 1 if C > 1 else C                    # sum_c p_c == 1 -> skip last
    n_t = C if (compute_last_tsum or C == 1) else C - 1

    def _out_spec(rows):
        return pl.BlockSpec((1, 1, rows, 128), lambda n, s, j: (n, s, 0, 0))

    kernel = functools.partial(
        _dice_partials_kernel,
        n_rows=n_rows, chunk=chunk, n_chunks=n_chunks, j_per_slot=j_per_slot,
        n_p=n_p, n_t=n_t, targets_are_labels=targets_are_labels,
        need_mask=need_mask)

    return pl.pallas_call(
        kernel,
        out_shape=(
            jax.ShapeDtypeStruct((N, n_slots, C, 128), jnp.float32),
            jax.ShapeDtypeStruct((N, n_slots, n_p, 128), jnp.float32),
            jax.ShapeDtypeStruct((N, n_slots, n_t, 128), jnp.float32),
        ),
        grid_spec=pltpu.PrefetchScalarGridSpec(
            num_scalar_prefetch=0,
            grid=(N, n_slots, j_per_slot),
            in_specs=[x_spec, t_spec],
            out_specs=(_out_spec(C), _out_spec(n_p), _out_spec(n_t)),
        ),
        compiler_params=pltpu.CompilerParams(
            dimension_semantics=("parallel", "parallel", "arbitrary"),
            vmem_limit_bytes=32 * 1024 * 1024,
        ),
    )(x, t)


def _combine_partials(inter_p, psum_p, tsum_p, organ_weights, C, total_pixels):
    """Tiny JAX epilogue: fold lane/batch/slot partials into the scalar loss."""
    eps = jnp.float32(1e-6)
    inter = jnp.sum(inter_p, axis=(0, 1, 3))       # (C,)
    psum = jnp.sum(psum_p, axis=(0, 1, 3))         # (n_p,)
    tsum = jnp.sum(tsum_p, axis=(0, 1, 3))         # (n_t,)
    tp = jnp.float32(total_pixels)
    if psum.shape[0] < C:      # reconstruct sum(p_{C-1}) via sum_c p_c == 1
        psum = jnp.concatenate([psum, (tp - jnp.sum(psum))[None]])
    if tsum.shape[0] < C:      # reconstruct sum(t_{C-1}) via sum_c t_c == 1
        tsum = jnp.concatenate([tsum, (tp - jnp.sum(tsum))[None]])
    iou = inter / (psum + tsum + 2.0 * eps)
    w = jnp.asarray(organ_weights, jnp.float32)
    return jnp.sum(w * (1.0 - 2.0 * iou)) / jnp.sum(w)


@functools.partial(
    jax.jit,
    static_argnames=("max_ts", "chunk_rows", "spatial_slots", "vmem_budget_bytes"))
def weighted_dice_loss(inputs, targets_onehot, organ_weights, *,
                       max_ts=512, chunk_rows=64, spatial_slots=None,
                       vmem_budget_bytes=8 * 1024 * 1024):
    """inputs: (N,C,H,W) logits; targets_onehot: (N,C,H,W); organ_weights: (C,)."""
    N, C, H, W = inputs.shape
    assert organ_weights.shape[0] == C
    inter_p, psum_p, tsum_p = _dice_partial_sums(
        inputs, targets_onehot, targets_are_labels=False, compute_last_tsum=True,
        max_ts=max_ts, chunk_rows=chunk_rows, spatial_slots=spatial_slots,
        vmem_budget_bytes=vmem_budget_bytes)
    return _combine_partials(inter_p, psum_p, tsum_p, organ_weights, C, N * H * W)


@functools.partial(
    jax.jit,
    static_argnames=("max_ts", "chunk_rows", "spatial_slots", "vmem_budget_bytes"))
def weighted_dice_loss_from_labels(inputs, labels, organ_weights, *,
                                   max_ts=512, chunk_rows=64, spatial_slots=None,
                                   vmem_budget_bytes=8 * 1024 * 1024):
    """Same loss with integer class labels (N,H,W), consumed in their stored
    dtype (int8/int32/...); the one-hot mask is built in-kernel."""
    N, C, H, W = inputs.shape
    assert organ_weights.shape[0] == C
    inter_p, psum_p, tsum_p = _dice_partial_sums(
        inputs, labels, targets_are_labels=True, compute_last_tsum=False,
        max_ts=max_ts, chunk_rows=chunk_rows, spatial_slots=spatial_slots,
        vmem_budget_bytes=vmem_budget_bytes)
    return _combine_partials(inter_p, psum_p, tsum_p, organ_weights, C, N * H * W)


def _reference_loss(inputs, targets_onehot, organ_weights):
    """Pure-JAX reference mirroring the PyTorch forward."""
    eps = 1e-6
    p = jax.nn.softmax(inputs.astype(jnp.float32), axis=1)
    t = targets_onehot.astype(jnp.float32)
    inter = jnp.sum(p * t, axis=(0, 2, 3))
    rsum = jnp.sum(p, axis=(0, 2, 3))
    tsum = jnp.sum(t, axis=(0, 2, 3))
    iou = inter / (rsum + tsum + 2.0 * eps)
    w = organ_weights.astype(jnp.float32)
    return jnp.sum(w * (1.0 - 2.0 * iou)) / jnp.sum(w)


if __name__ == "__main__":
    # module defaults: organIDs=[0,1,2], organWeights=[340,3,1] -> C = 3
    organ_weights = jnp.array([340.0, 3.0, 1.0], dtype=jnp.float32)

    N, C, H, W = 2, 3, 16, 16
    key = jax.random.PRNGKey(0)
    k1, k2 = jax.random.split(key)
    logits = jax.random.normal(k1, (N, C, H, W), dtype=jnp.float32)
    labels = jax.random.randint(k2, (N, H, W), 0, C, dtype=jnp.int32)
    onehot = jnp.transpose(jax.nn.one_hot(labels, C, dtype=jnp.float32),
                           (0, 3, 1, 2))           # (N, C, H, W)

    ref = _reference_loss(logits, onehot, organ_weights)

    # 1) one-hot targets path (f32 / f32)
    loss = weighted_dice_loss(logits, onehot, organ_weights)
    jax.block_until_ready(loss)
    np.testing.assert_allclose(np.asarray(loss), np.asarray(ref),
                               rtol=1e-5, atol=1e-5)

    # 2) integer-labels path (in-kernel one-hot, ~Cx less target HBM traffic)
    loss_lbl = weighted_dice_loss_from_labels(logits, labels, organ_weights)
    jax.block_until_ready(loss_lbl)
    np.testing.assert_allclose(np.asarray(loss_lbl), np.asarray(ref),
                               rtol=1e-5, atol=1e-5)

    # 3) low-HBM-traffic config: bf16 logits + int8 labels (v5e roofline case)
    loss_lp = weighted_dice_loss_from_labels(
        logits.astype(jnp.bfloat16), labels.astype(jnp.int8), organ_weights)
    jax.block_until_ready(loss_lp)
    np.testing.assert_allclose(np.asarray(loss_lp), np.asarray(ref),
                               rtol=5e-2, atol=5e-2)

    # 4) ragged spatial tiling + multi-step accumulation + spatial slots (N=1)
    N2, H2, W2 = 1, 48, 48                      # 18 row-blocks of 128 lanes
    k3, k4 = jax.random.split(k2)
    logits2 = jax.random.normal(k3, (N2, C, H2, W2), dtype=jnp.float32)
    labels2 = jax.random.randint(k4, (N2, H2, W2), 0, C, dtype=jnp.int32)
    onehot2 = jnp.transpose(jax.nn.one_hot(labels2, C, dtype=jnp.float32),
                            (0, 3, 1, 2))
    ref2 = _reference_loss(logits2, onehot2, organ_weights)
    loss2 = weighted_dice_loss_from_labels(logits2, labels2, organ_weights,
                                           max_ts=8, chunk_rows=8)
    jax.block_until_ready(loss2)
    np.testing.assert_allclose(np.asarray(loss2), np.asarray(ref2),
                               rtol=1e-5, atol=1e-5)

    print("KERNEL_OK")
</pallas_src>

<mosaic_0001>
module attributes {stable_mosaic.version = 11 : i64} {
  func.func @_dice_partials_kernel(%arg0: i32, %arg1: i32, %arg2: i32, %arg3: memref<1x3x64x128xf32, #tpu.memory_space<vmem>>, %arg4: memref<1x3x64x128xf32, #tpu.memory_space<vmem>>, %arg5: memref<1x1x3x128xf32, #tpu.memory_space<vmem>>, %arg6: memref<1x1x2x128xf32, #tpu.memory_space<vmem>>, %arg7: memref<1x1x3x128xf32, #tpu.memory_space<vmem>>) attributes {dimension_semantics = [#tpu.dimension_semantics<parallel>, #tpu.dimension_semantics<parallel>, #tpu.dimension_semantics<arbitrary>], iteration_bounds = array<i64: 2, 1, 1>, scalar_prefetch = 0 : i64, scratch_operands = 0 : i64, tpu.core_type = #tpu.core_type<tc>, window_params = [{transform_indices = @transform_0, window_bounds = array<i64: 1, 3, 64, 128>}, {transform_indices = @transform_1, window_bounds = array<i64: 1, 3, 64, 128>}, {transform_indices = @transform_2, window_bounds = array<i64: 1, 1, 3, 128>}, {transform_indices = @transform_3, window_bounds = array<i64: 1, 1, 2, 128>}, {transform_indices = @transform_4, window_bounds = array<i64: 1, 1, 3, 128>}]} {
    %c0_i32 = arith.constant 0 : i32
    %0 = arith.cmpi eq, %arg2, %c0_i32 : i32
    %1 = arith.extui %0 : i1 to i32
    %c0_i32_0 = arith.constant 0 : i32
    %2 = arith.cmpi ne, %1, %c0_i32_0 : i32
    scf.if %2 {
      %cst_43 = arith.constant 0.000000e+00 : f32
      %71 = vector.broadcast %cst_43 : f32 to vector<1x1x3x128xf32>
      %c0_44 = arith.constant 0 : index
      %c0_45 = arith.constant 0 : index
      %c0_46 = arith.constant 0 : index
      %c0_47 = arith.constant 0 : index
      %72 = vector.load %arg5[%c0_44, %c0_45, %c0_46, %c0_47] : memref<1x1x3x128xf32, #tpu.memory_space<vmem>>, vector<1x1x3x128xf32>
      tpu.vector_store %arg5[%c0_44, %c0_45, %c0_46, %c0_47], %71 {strides = array<i32>} : memref<1x1x3x128xf32, #tpu.memory_space<vmem>>, vector<1x1x3x128xf32>,
      %cst_48 = arith.constant 0.000000e+00 : f32
      %73 = vector.broadcast %cst_48 : f32 to vector<1x1x2x128xf32>
      %c0_49 = arith.constant 0 : index
      %c0_50 = arith.constant 0 : index
      %c0_51 = arith.constant 0 : index
      %c0_52 = arith.constant 0 : index
      %74 = vector.load %arg6[%c0_49, %c0_50, %c0_51, %c0_52] : memref<1x1x2x128xf32, #tpu.memory_space<vmem>>, vector<1x1x2x128xf32>
      tpu.vector_store %arg6[%c0_49, %c0_50, %c0_51, %c0_52], %73 {strides = array<i32>} : memref<1x1x2x128xf32, #tpu.memory_space<vmem>>, vector<1x1x2x128xf32>,
      %cst_53 = arith.constant 0.000000e+00 : f32
      %75 = vector.broadcast %cst_53 : f32 to vector<1x1x3x128xf32>
      %c0_54 = arith.constant 0 : index
      %c0_55 = arith.constant 0 : index
      %c0_56 = arith.constant 0 : index
      %c0_57 = arith.constant 0 : index
      %76 = vector.load %arg7[%c0_54, %c0_55, %c0_56, %c0_57] : memref<1x1x3x128xf32, #tpu.memory_space<vmem>>, vector<1x1x3x128xf32>
      tpu.vector_store %arg7[%c0_54, %c0_55, %c0_56, %c0_57], %75 {strides = array<i32>} : memref<1x1x3x128xf32, #tpu.memory_space<vmem>>, vector<1x1x3x128xf32>,
    } else {
    }
    %c1_i32 = arith.constant 1 : i32
    %3 = arith.muli %arg1, %c1_i32 : i32
    %4 = arith.addi %3, %arg2 : i32
    %c64_i32 = arith.constant 64 : i32
    %5 = arith.muli %4, %c64_i32 : i32
    %c2_i32 = arith.constant 2 : i32
    %6 = arith.subi %c2_i32, %5 : i32
    %cst = arith.constant 0.000000e+00 : f32
    %7 = vector.broadcast %cst : f32 to vector<3x128xf32>
    %cst_1 = arith.constant 0.000000e+00 : f32
    %8 = vector.broadcast %cst_1 : f32 to vector<2x128xf32>
    %cst_2 = arith.constant 0.000000e+00 : f32
    %9 = vector.broadcast %cst_2 : f32 to vector<3x128xf32>
    %c0_i32_3 = arith.constant 0 : i32
    %c64_i32_4 = arith.constant 64 : i32
    %10 = arith.muli %c0_i32_3, %c64_i32_4 : i32
    %11 = tpu.assume_multiple %10, 64 : i32
    %c0 = arith.constant 0 : index
    %c0_5 = arith.constant 0 : index
    %12 = arith.index_cast %11 : i32 to index
    %c0_6 = arith.constant 0 : index
    %13 = vector.load %arg3[%c0, %c0_5, %12, %c0_6] : memref<1x3x64x128xf32, #tpu.memory_space<vmem>>, vector<1x3x64x128xf32>
    %14 = vector.shape_cast %13 : vector<1x3x64x128xf32> to vector<3x64x128xf32>
    %cst_7 = arith.constant dense<0xFF800000> : vector<64x128xf32>
    %15 = vector.multi_reduction <maximumf>, %14, %cst_7 [0] : vector<3x64x128xf32> to vector<64x128xf32>
    %16 = vector.shape_cast %15 : vector<64x128xf32> to vector<1x64x128xf32>
    %17 = vector.broadcast %16 : vector<1x64x128xf32> to vector<3x64x128xf32>
    %18 = arith.subf %14, %17 : vector<3x64x128xf32>
    %19 = math.exp %18 : vector<3x64x128xf32>
    %cst_8 = arith.constant dense<0.000000e+00> : vector<64x128xf32>
    %20 = vector.multi_reduction <add>, %19, %cst_8 [0] : vector<3x64x128xf32> to vector<64x128xf32>
    %21 = vector.shape_cast %20 : vector<64x128xf32> to vector<1x64x128xf32>
    %22 = tpu.reciprocal %21 {approx = true} : vector<1x64x128xf32> -> vector<1x64x128xf32>
    %23 = arith.mulf %21, %22 : vector<1x64x128xf32>
    %cst_9 = arith.constant 2.000000e+00 : f32
    %24 = vector.broadcast %cst_9 : f32 to vector<1x64x128xf32>
    %25 = arith.subf %24, %23 : vector<1x64x128xf32>
    %26 = arith.mulf %22, %25 : vector<1x64x128xf32>
    %27 = vector.broadcast %26 : vector<1x64x128xf32> to vector<3x64x128xf32>
    %28 = arith.mulf %19, %27 : vector<3x64x128xf32>
    %c0_10 = arith.constant 0 : index
    %c0_11 = arith.constant 0 : index
    %29 = arith.index_cast %11 : i32 to index
    %c0_12 = arith.constant 0 : index
    %30 = vector.load %arg4[%c0_10, %c0_11, %29, %c0_12] : memref<1x3x64x128xf32, #tpu.memory_space<vmem>>, vector<1x3x64x128xf32>
    %31 = vector.shape_cast %30 : vector<1x3x64x128xf32> to vector<3x64x128xf32>
    %32 = tpu.iota {dimensions = array<i32: 0>} : vector<64x128xi32>
    %33 = arith.subi %6, %11 : i32
    %34 = vector.broadcast %33 : i32 to vector<64x128xi32>
    %35 = arith.cmpi slt, %32, %34 : vector<64x128xi32>
    %36 = vector.shape_cast %35 : vector<64x128xi1> to vector<1x64x128xi1>
    %cst_13 = arith.constant 0.000000e+00 : f32
    %37 = vector.shape_cast %36 : vector<1x64x128xi1> to vector<1x64x128xi1>
    %38 = vector.broadcast %37 : vector<1x64x128xi1> to vector<3x64x128xi1>
    %39 = vector.broadcast %cst_13 : f32 to vector<3x64x128xf32>
    %40 = arith.select %38, %28, %39 : vector<3x64x128xi1>, vector<3x64x128xf32>
    %cst_14 = arith.constant 0.000000e+00 : f32
    %41 = vector.shape_cast %36 : vector<1x64x128xi1> to vector<1x64x128xi1>
    %42 = vector.broadcast %41 : vector<1x64x128xi1> to vector<3x64x128xi1>
    %43 = vector.broadcast %cst_14 : f32 to vector<3x64x128xf32>
    %44 = arith.select %42, %31, %43 : vector<3x64x128xi1>, vector<3x64x128xf32>
    %45 = arith.mulf %40, %44 : vector<3x64x128xf32>
    %cst_15 = arith.constant dense<0.000000e+00> : vector<3x128xf32>
    %46 = vector.multi_reduction <add>, %45, %cst_15 [1] : vector<3x64x128xf32> to vector<3x128xf32>
    %47 = arith.addf %7, %46 : vector<3x128xf32>
    %48 = vector.extract_strided_slice %40 {offsets = [0, 0, 0], sizes = [2, 64, 128], strides = [1, 1, 1]} : vector<3x64x128xf32> to vector<2x64x128xf32>
    %cst_16 = arith.constant dense<0.000000e+00> : vector<2x128xf32>
    %49 = vector.multi_reduction <add>, %48, %cst_16 [1] : vector<2x64x128xf32> to vector<2x128xf32>
    %50 = arith.addf %8, %49 : vector<2x128xf32>
    %cst_17 = arith.constant dense<0.000000e+00> : vector<3x128xf32>
    %51 = vector.multi_reduction <add>, %44, %cst_17 [1] : vector<3x64x128xf32> to vector<3x128xf32>
    %52 = arith.addf %9, %51 : vector<3x128xf32>
    %c1_i32_18 = arith.constant 1 : i32
    %c0_19 = arith.constant 0 : index
    %c0_20 = arith.constant 0 : index
    %c0_21 = arith.constant 0 : index
    %c0_22 = arith.constant 0 : index
    %53 = vector.load %arg5[%c0_19, %c0_20, %c0_21, %c0_22] : memref<1x1x3x128xf32, #tpu.memory_space<vmem>>, vector<1x1x3x128xf32>
    %54 = vector.shape_cast %53 : vector<1x1x3x128xf32> to vector<3x128xf32>
    %55 = arith.addf %54, %47 : vector<3x128xf32>
    %c0_23 = arith.constant 0 : index
    %c0_24 = arith.constant 0 : index
    %c0_25 = arith.constant 0 : index
    %c0_26 = arith.constant 0 : index
    %56 = vector.load %arg5[%c0_23, %c0_24, %c0_25, %c0_26] : memref<1x1x3x128xf32, #tpu.memory_space<vmem>>, vector<1x1x3x128xf32>
    %57 = vector.shape_cast %56 : vector<1x1x3x128xf32> to vector<3x128xf32>
    %58 = vector.shape_cast %55 : vector<3x128xf32> to vector<1x1x3x128xf32>
    tpu.vector_store %arg5[%c0_23, %c0_24, %c0_25, %c0_26], %58 {strides = array<i32>} : memref<1x1x3x128xf32, #tpu.memory_space<vmem>>, vector<1x1x3x128xf32>,
    %c0_27 = arith.constant 0 : index
    %c0_28 = arith.constant 0 : index
    %c0_29 = arith.constant 0 : index
    %c0_30 = arith.constant 0 : index
    %59 = vector.load %arg6[%c0_27, %c0_28, %c0_29, %c0_30] : memref<1x1x2x128xf32, #tpu.memory_space<vmem>>, vector<1x1x2x128xf32>
    %60 = vector.shape_cast %59 : vector<1x1x2x128xf32> to vector<2x128xf32>
    %61 = arith.addf %60, %50 : vector<2x128xf32>
    %c0_31 = arith.constant 0 : index
    %c0_32 = arith.constant 0 : index
    %c0_33 = arith.constant 0 : index
    %c0_34 = arith.constant 0 : index
    %62 = vector.load %arg6[%c0_31, %c0_32, %c0_33, %c0_34] : memref<1x1x2x128xf32, #tpu.memory_space<vmem>>, vector<1x1x2x128xf32>
    %63 = vector.shape_cast %62 : vector<1x1x2x128xf32> to vector<2x128xf32>
    %64 = vector.shape_cast %61 : vector<2x128xf32> to vector<1x1x2x128xf32>
    tpu.vector_store %arg6[%c0_31, %c0_32, %c0_33, %c0_34], %64 {strides = array<i32>} : memref<1x1x2x128xf32, #tpu.memory_space<vmem>>, vector<1x1x2x128xf32>,
    %c0_35 = arith.constant 0 : index
    %c0_36 = arith.constant 0 : index
    %c0_37 = arith.constant 0 : index
    %c0_38 = arith.constant 0 : index
    %65 = vector.load %arg7[%c0_35, %c0_36, %c0_37, %c0_38] : memref<1x1x3x128xf32, #tpu.memory_space<vmem>>, vector<1x1x3x128xf32>
    %66 = vector.shape_cast %65 : vector<1x1x3x128xf32> to vector<3x128xf32>
    %67 = arith.addf %66, %52 : vector<3x128xf32>
    %c0_39 = arith.constant 0 : index
    %c0_40 = arith.constant 0 : index
    %c0_41 = arith.constant 0 : index
    %c0_42 = arith.constant 0 : index
    %68 = vector.load %arg7[%c0_39, %c0_40, %c0_41, %c0_42] : memref<1x1x3x128xf32, #tpu.memory_space<vmem>>, vector<1x1x3x128xf32>
    %69 = vector.shape_cast %68 : vector<1x1x3x128xf32> to vector<3x128xf32>
    %70 = vector.shape_cast %67 : vector<3x128xf32> to vector<1x1x3x128xf32>
    tpu.vector_store %arg7[%c0_39, %c0_40, %c0_41, %c0_42], %70 {strides = array<i32>} : memref<1x1x3x128xf32, #tpu.memory_space<vmem>>, vector<1x1x3x128xf32>,
    return
  }
  func.func @transform_0(%arg0: i32, %arg1: i32, %arg2: i32) -> (i32, i32, i32, i32) {
    %c1_i32 = arith.constant 1 : i32
    %0 = arith.muli %arg1, %c1_i32 : i32
    %1 = arith.addi %0, %arg2 : i32
    %c0_i32 = arith.constant 0 : i32
    %c0_i32_0 = arith.constant 0 : i32
    %c0_i32_1 = arith.constant 0 : i32
    return %arg0, %c0_i32, %1, %c0_i32_0 : i32, i32, i32, i32
  }
  func.func @transform_1(%arg0: i32, %arg1: i32, %arg2: i32) -> (i32, i32, i32, i32) {
    %c1_i32 = arith.constant 1 : i32
    %0 = arith.muli %arg1, %c1_i32 : i32
    %1 = arith.addi %0, %arg2 : i32
    %c0_i32 = arith.constant 0 : i32
    %c0_i32_0 = arith.constant 0 : i32
    %c0_i32_1 = arith.constant 0 : i32
    return %arg0, %c0_i32, %1, %c0_i32_0 : i32, i32, i32, i32
  }
  func.func @transform_2(%arg0: i32, %arg1: i32, %arg2: i32) -> (i32, i32, i32, i32) {
    %c0_i32 = arith.constant 0 : i32
    %c0_i32_0 = arith.constant 0 : i32
    %c0_i32_1 = arith.constant 0 : i32
    return %arg0, %arg1, %c0_i32, %c0_i32_0 : i32, i32, i32, i32
  }
  func.func @transform_3(%arg0: i32, %arg1: i32, %arg2: i32) -> (i32, i32, i32, i32) {
    %c0_i32 = arith.constant 0 : i32
    %c0_i32_0 = arith.constant 0 : i32
    %c0_i32_1 = arith.constant 0 : i32
    return %arg0, %arg1, %c0_i32, %c0_i32_0 : i32, i32, i32, i32
  }
  func.func @transform_4(%arg0: i32, %arg1: i32, %arg2: i32) -> (i32, i32, i32, i32) {
    %c0_i32 = arith.constant 0 : i32
    %c0_i32_0 = arith.constant 0 : i32
    %c0_i32_1 = arith.constant 0 : i32
    return %arg0, %arg1, %c0_i32, %c0_i32_0 : i32, i32, i32, i32
  }
}

</mosaic_0001>

<bundles_post_ra>
// kernel: weighted_dice_loss.1
= control target key start
LH: loop header
LB: loop body
LE: loop exit
PB: predicated region body
PF: predicated region fallthrough
CT: control target
= control target key end

     0   :  { %s1358_s15 = smov 0   ;;  %s1360_s16 = smov 0   ;;  %s1478_s0 = inlined_call_operand.vmem [shape: f32[2,3,2,128], index: 0, kind: input, shape index: {}]   ;;  %s1479_s1 = inlined_call_operand.vmem [shape: f32[2,3,2,128], index: 1, kind: input, shape index: {}]   ;;  %s1480_s2 = inlined_call_operand.vmem [shape: f32[2,1,3,128], index: 2, kind: output, shape index: {0}]   ;;  %s1481_s3 = inlined_call_operand.vmem [shape: f32[2,1,2,128], index: 3, kind: output, shape index: {1}]   ;;  %s1482_s4 = inlined_call_operand.vmem [shape: f32[2,1,3,128], index: 4, kind: output, shape index: {2}]  }
   0x1   :  { %s1362_s17 = smov 0   ;;  %s1364_s18 = smov 0  }
   0x2   :  { %s1366_s19 = smov 0  }
   0x3 LB: > { %s34_s20 = sadd.s32 1, %s1318_s18  ;;  %p52_p1 = scmp.ne.s32.totalorder %s1310_s16, %s1306_s15  ;;  %s1322_s19 = sphi %s1366_s19, %s15_s19   ;;  %s1318_s18 = sphi %s1364_s18, %s1487_s18   ;;  %s1314_s17 = sphi %s1362_s17, %s1486_s17   ;;  %s1310_s16 = sphi %s1360_s16, %s1485_s16   ;;  %s1306_s15 = sphi %s1358_s15, %s1484_s15  }
   0x4   : > { %p36_p0 = scmp.ge.s32.totalorder %s34_s20, 2  ;;  %p53_p2 = scmp.eq.s32.totalorder %s1322_s19, 0 }
   0x5   : > { %s45_s23 = sadd.s32 1, %s1310_s16  ;;  %p1121_p5 = scmp.ge.s32.totalorder %s1322_s19, 2 }
   0x6   : > { %s1489_s20 = smov (%p36_p0, %s34_s20), 0  ;;  %p1389_p3 = por %p53_p2, %p52_p1 }
   0x7   : > { %s40_s22 = ssub.s32 %s1318_s18, %s1489_s20  ;;  %192 = sbr.rel (%p1121_p5) target bundleno = 40 (0x28), region = 16 }
   0x8   : > { %p43_p4 = scmp.eq.s32.totalorder %s40_s22, 0 }
   0xa   : > { %s1397_s24 = scalar_select %p43_p4, %s1310_s16, %s45_s23  }
   0xc   : > { %195 = sbr.rel (!%p1389_p3) target bundleno = 26 (0x1a), region = 20  ;;  %s197_s25 = sand.u32 (%p1389_p3), 1, %s1310_s16  }
   0xd   : > { %s1135_s26 = smul.u32 (%p1389_p3), 6, %s1318_s18  ;;  %s1324_s6 = smov (%p1389_p3), 0  }
   0xe   : > { %s1134_s27 = smul.u32 (%p1389_p3), 192, %s197_s25 }
   0xf   : > { %s208_s30 = scalar_lea.vmem (%p1389_p3), %s1478_s0, %s1135_s26  }
  0x10   : > { %s199_s5 = scalar_lea.vmem (%p1389_p3), [#allocation2], %s1134_s27  }
  0x11 LB: >> { %v227_v0 = vld [vmem:[%s208_s30] sm:$0x3]  ;;  %v229_v1 = vld [vmem:[%s208_s30 + $0x2] sm:$0x3]  ;;  %v231_v2 = vld [vmem:[%s208_s30 + $0x4] sm:$0x3]  ;;  %s1326_s6 = sphi %s1324_s6, %s221_s6  }
  0x12   : >> { %228 = vst [vmem:[%s199_s5] sm:$0x3] %v227_v0  ;;  %230 = vst [vmem:[%s199_s5 + $0x40] sm:$0x3] %v229_v1  ;;  %s221_s6 = sadd.s32 1, %s1326_s6  }
  0x13   : >> { %232 = vst [vmem:[%s199_s5 + $0x80] sm:$0x3] %v231_v2  ;;  %p220_p6 = scmp.ge.s32.totalorder %s221_s6, 1 }
  0x15   : > { %223 = sbr.rel (!%p220_p6) target bundleno = 17 (0x11), region = 167 }
  0x1a PF: > { %269 = sbr.rel (!%p1389_p3) target bundleno = 40 (0x28), region = 54  ;;  %s271_s7 = sand.u32 (%p1389_p3), 1, %s1310_s16  }
  0x1b   : > { %s1137_s8 = smul.u32 (%p1389_p3), 6, %s1318_s18  ;;  %s1328_s14 = smov (%p1389_p3), 0  }
  0x1c   : > { %s1136_s9 = smul.u32 (%p1389_p3), 192, %s271_s7 }
  0x1d   : > { %s282_s12 = scalar_lea.vmem (%p1389_p3), %s1479_s1, %s1137_s8  }
  0x1e   : > { %s273_s13 = scalar_lea.vmem (%p1389_p3), [#allocation3], %s1136_s9  }
  0x1f LB: >> { %v301_v3 = vld [vmem:[%s282_s12] sm:$0x3]  ;;  %v303_v4 = vld [vmem:[%s282_s12 + $0x2] sm:$0x3]  ;;  %v305_v5 = vld [vmem:[%s282_s12 + $0x4] sm:$0x3]  ;;  %s1330_s14 = sphi %s1328_s14, %s295_s14  }
  0x20   : >> { %302 = vst [vmem:[%s273_s13] sm:$0x3] %v301_v3  ;;  %304 = vst [vmem:[%s273_s13 + $0x40] sm:$0x3] %v303_v4  ;;  %s295_s14 = sadd.s32 1, %s1330_s14  }
  0x21   : >> { %306 = vst [vmem:[%s273_s13 + $0x80] sm:$0x3] %v305_v5  ;;  %p294_p7 = scmp.ge.s32.totalorder %s295_s14, 1 }
  0x23   : > { %297 = sbr.rel (!%p294_p7) target bundleno = 31 (0x1f), region = 178 }
  0x28 PF: > { %p1128_p8 = scmp.ge.s32.totalorder %s1322_s19, 1  ;;  %p342_p9 = scmp.lt.s32.totalorder %s1322_s19, 3 }
  0x2a   : > { %p343_p10 = pnand %p1128_p8, %p342_p9 }
  0x2b   : > { %p409_p11 = scmp.lt.s32.totalorder (!%p343_p10), %s1314_s17, 1  ;;  %s349_s21 = sand.u32 (!%p343_p10), 1, %s1306_s15  }
  0x2c   : > { %346 = sbr.rel (%p343_p10) target bundleno = 120 (0x78), region = 88 }
  0x2d   : > { %s1138_s22 = smul.u32 (!%p343_p10), 192, %s349_s21 }
  0x2f   : > { %s351_s26 = scalar_lea.vmem (!%p343_p10), [#allocation2], %s1138_s22 }
  0x31   : > { %v648_v6 = vlaneseq  ;;  %s1491_s17 = smov (!%p409_p11, %s1314_s17), 1  ;;  %v440_v8 = vld [vmem:[%s351_s26] sm:$0xff]  ;;  %v1332_v15 = vmov 0.0   ;;  %vm871_vm1 = vcmask 1041409   ;;  %vm873_vm2 = vcmask 1042434  }
  0x32   : > { %s1129_s23 = sshll.u32 %s1491_s17, 2  ;;  %s1130_s25 = sshll.u32 %s1491_s17, 1  ;;  %v448_v9 = vld [vmem:[%s351_s26 + $0x40] sm:$0xff] }
  0x33   : > { %v1419_v7 = vshrl.u32 %v648_v6, 7  ;;  %v456_v10 = vld [vmem:[%s351_s26 + $0x80] sm:$0xff]  ;;  %s1425_s29 = scalar_lea.vmem %s1480_s2, %s1129_s23  ;;  %s1430_s5 = scalar_lea.vmem %s1481_s3, %s1130_s25  ;;  %v464_v11 = vmax.f32 %v440_v8, %v448_v9 }
  0x34   : > { %s358_s17 = scalar_lea.vmem [#allocation3], %s1138_s22  ;;  %434 = vst [vmem:[%s1425_s29] sm:$0x7] %v1332_v15  ;;  %435 = vst [vmem:[%s1430_s5] sm:$0x3] %v1332_v15  ;;  %s1437_s8 = scalar_lea.vmem %s1482_s4, %s1129_s23 }
  0x35   : > { %vm659_vm0 = vcmp.lt.s32.totalorder %v1419_v7, 2  ;;  %v624_v12 = vld [vmem:[%s358_s17] sm:$0xff]  ;;  %436 = vst [vmem:[%s1437_s8] sm:$0x7] %v1332_v15  ;;  %v465_v19 = vmax.f32 %v464_v11, %v456_v10 }
  0x36   : > { %v632_v13 = vld [vmem:[%s358_s17 + $0x40] sm:$0xff]  ;;  %v707_v16 = vsel %vm659_vm0, %v624_v12, 0.0 }
  0x37   : > { %v640_v14 = vld [vmem:[%s358_s17 + $0x80] sm:$0xff]  ;;  %v715_v17 = vsel %vm659_vm0, %v632_v13, 0.0  ;;  %v832_v20 = vrot.slane %v707_v16, 4  ;;  %v480_v23 = vsub.f32 %v440_v8, %v465_v19  ;;  %v488_v24 = vsub.f32 %v448_v9, %v465_v19 }
  0x38   : > { %v723_v18 = vsel %vm659_vm0, %v640_v14, 0.0  ;;  %v845_v21 = vrot.slane %v715_v17, 4  ;;  %v496_v25 = vsub.f32 %v456_v10, %v465_v19 }
  0x39   : > { %v858_v22 = vrot.slane %v723_v18, 4  ;;  %v833_v26 = vadd.f32 %v832_v20, %v707_v16  ;;  %v504_v29 = vmul.f32 1.442695, %v480_v23  ;;  %v520_v30 = vmul.f32 1.442695, %v488_v24 }
  0x3a   : > { %v846_v27 = vadd.f32 %v845_v21, %v715_v17  ;;  %v536_v31 = vmul.f32 1.442695, %v496_v25 }
  0x3b   : > { %v859_v28 = vadd.f32 %v858_v22, %v723_v18  ;;  %v834_v32 = vrot.slane %v833_v26, 2  ;;  %1244 = vpow2.f32 %v504_v29  ;;  %v878_v29 = vld [vmem:[%s1430_s5] sm:$0x3] }
  0x3c   : > { %v847_v33 = vrot.slane %v846_v27, 2  ;;  %1246 = vpow2.f32 %v520_v30  ;;  %v885_v44 = vld [vmem:[%s1437_s8] sm:$0x7] }
  0x3d   : > { %v860_v34 = vrot.slane %v859_v28, 2  ;;  %v835_v35 = vadd.f32 %v834_v32, %v833_v26  ;;  %1248 = vpow2.f32 %v536_v31 }
  0x3e   : > { %v848_v36 = vadd.f32 %v847_v33, %v846_v27  ;;  %v867_v33 = vld [vmem:[%s1425_s29] sm:$0x7] }
  0x3f   : > { %v861_v37 = vadd.f32 %v860_v34, %v859_v28  ;;  %v836_v38 = vrot.slane %v835_v35, 1 }
  0x40   : > { %v849_v39 = vrot.slane %v848_v36, 1 }
  0x41   : > { %v862_v40 = vrot.slane %v861_v37, 1  ;;  %v837_v41 = vadd.f32 %v836_v38, %v835_v35 }
  0x42   : > { %v850_v42 = vadd.f32 %v849_v39, %v848_v36 }
  0x43   : > { %v863_v43 = vadd.f32 %v862_v40, %v861_v37 }
  0x44   : > { %v889_v45 = vsel %vm871_vm1, %v850_v42, %v837_v41 }
  0x45   : > { %v890_v46 = vsel %vm873_vm2, %v863_v43, %v889_v45 }
  0x46   : > { %v892_v47 = vadd.f32 %v890_v46, %v885_v44 }
  0x48   : > { %893 = vst [vmem:[%s1437_s8] sm:$0x7] %v892_v47  ;;  %v1245_v48 = vpop.eup %1244 }
  0x49   : > { %v1247_v49 = vpop.eup %1246 }
  0x4a   : > { %v1249_v50 = vpop.eup %1248  ;;  %v552_v51 = vadd.f32 %v1247_v49, %v1245_v48 }
  0x4c   : > { %v553_v52 = vadd.f32 %v1249_v50, %v552_v51 }
  0x4e   : > { %1250 = vrcp.f32 %v553_v52 }
  0x5b   : > { %v1251_v53 = vpop.eup %1250 }
  0x5c   : > { %v576_v54 = vmul.f32 %v1251_v53, %v553_v52 }
  0x5e   : > { %v584_v55 = vsub.f32 2.0, %v576_v54 }
  0x60   : > { %v592_v56 = vmul.f32 %v1251_v53, %v584_v55 }
  0x62   : > { %v600_v57 = vmul.f32 %v1245_v48, %v592_v56  ;;  %v608_v58 = vmul.f32 %v1247_v49, %v592_v56  ;;  %v616_v59 = vmul.f32 %v1249_v50, %v592_v56 }
  0x64   : > { %v683_v60 = vsel %vm659_vm0, %v600_v57, 0.0  ;;  %v691_v61 = vsel %vm659_vm0, %v608_v58, 0.0  ;;  %v699_v62 = vsel %vm659_vm0, %v616_v59, 0.0 }
  0x65   : > { %v731_v63 = vmul.f32 %v707_v16, %v683_v60  ;;  %v739_v0 = vmul.f32 %v715_v17, %v691_v61  ;;  %v747_v1 = vmul.f32 %v723_v18, %v699_v62  ;;  %v804_v2 = vrot.slane %v683_v60, 4 }
  0x66   : > { %v817_v3 = vrot.slane %v691_v61, 4 }
  0x67   : > { %v762_v4 = vrot.slane %v731_v63, 4  ;;  %v775_v5 = vrot.slane %v739_v0, 4  ;;  %v788_v6 = vrot.slane %v747_v1, 4  ;;  %v805_v8 = vadd.f32 %v804_v2, %v683_v60 }
  0x68   : > { %v818_v9 = vadd.f32 %v817_v3, %v691_v61 }
  0x69   : > { %v763_v10 = vadd.f32 %v762_v4, %v731_v63  ;;  %v776_v11 = vadd.f32 %v775_v5, %v739_v0  ;;  %v789_v12 = vadd.f32 %v788_v6, %v747_v1  ;;  %v806_v13 = vrot.slane %v805_v8, 2 }
  0x6a   : > { %v819_v14 = vrot.slane %v818_v9, 2 }
  0x6b   : > { %v764_v15 = vrot.slane %v763_v10, 2  ;;  %v777_v19 = vrot.slane %v776_v11, 2  ;;  %v790_v7 = vrot.slane %v789_v12, 2  ;;  %v807_v20 = vadd.f32 %v806_v13, %v805_v8 }
  0x6c   : > { %v820_v16 = vadd.f32 %v819_v14, %v818_v9 }
  0x6d   : > { %v765_v17 = vadd.f32 %v764_v15, %v763_v10  ;;  %v778_v18 = vadd.f32 %v777_v19, %v776_v11  ;;  %v791_v21 = vadd.f32 %v790_v7, %v789_v12  ;;  %v808_v22 = vrot.slane %v807_v20, 1 }
  0x6e   : > { %v821_v23 = vrot.slane %v820_v16, 1 }
  0x6f   : > { %v766_v24 = vrot.slane %v765_v17, 1  ;;  %v779_v25 = vrot.slane %v778_v18, 1  ;;  %v792_v26 = vrot.slane %v791_v21, 1  ;;  %v809_v27 = vadd.f32 %v808_v22, %v807_v20 }
  0x70   : > { %v822_v28 = vadd.f32 %v821_v23, %v820_v16 }
  0x71   : > { %v767_v30 = vadd.f32 %v766_v24, %v765_v17  ;;  %v780_v31 = vadd.f32 %v779_v25, %v778_v18  ;;  %v793_v32 = vadd.f32 %v792_v26, %v791_v21 }
  0x72   : > { %v881_v34 = vsel %vm871_vm1, %v822_v28, %v809_v27 }
  0x73   : > { %v872_v35 = vsel %vm871_vm1, %v780_v31, %v767_v30  ;;  %v883_v36 = vadd.f32 %v881_v34, %v878_v29 }
  0x74   : > { %v874_v37 = vsel %vm873_vm2, %v793_v32, %v872_v35 }
  0x75   : > { %v876_v38 = vadd.f32 %v874_v37, %v867_v33  ;;  %884 = vst [vmem:[%s1430_s5] sm:$0x3] %v883_v36 }
  0x77   : > { %877 = vst [vmem:[%s1425_s29] sm:$0x7] %v876_v38 }
  0x78 PF: > { %s15_s19 = sadd.s32 1, %s1322_s19   ;;  %s1484_s15 = smov %s1310_s16 }
  0x79   : > { %p12_p12 = scmp.ge.s32.totalorder %s15_s19, 4   ;;  %s1485_s16 = smov %s1397_s24 }
  0x7a   : > { %s1486_s17 = smov %s1318_s18  ;;  %s1487_s18 = smov %s1489_s20 }
  0x7b   :  { %14 = sbr.rel (!%p12_p12) target bundleno = 3 (0x3), region = 189 }

</bundles_post_ra>
